<compile_context>
chip_gen: v7x
topology: tpu7x:2x2x1
jax: 0.10.0
libtpu: 0.0.40
codegen_flags: <defaults>
</compile_context>

<pallas_src>
import functools

import numpy as np
import jax
import jax.numpy as jnp
from jax.experimental import pallas as pl
from jax.experimental.pallas import tpu as pltpu


def _make_shift_groups(out_channels: int):
    """Static (c_start, c_end, dy, dx) per 3x3 tap, mirroring Shift3x3.__init__.

    For channels in [c_start, c_end):  out[c, y, x] = x[c, y+dy, x+dx]
    (zero outside bounds), with dy = i - 1, dx = j - 1.
    """
    groups = []
    channel_idx = 0
    for i in range(3):
        for j in range(3):
            num_channels = out_channels // 9
            if i == 1 and j == 1:
                num_channels += out_channels % 9
            if num_channels > 0:
                groups.append((channel_idx, channel_idx + num_channels, i - 1, j - 1))
            channel_idx += num_channels
    return tuple(groups)


def make_shift3x3_weights(out_channels: int) -> jnp.ndarray:
    """(C, 3, 3) one-hot depthwise weights; only used to build the reference conv."""
    k = np.zeros((out_channels, 3, 3), np.float32)
    for cs, ce, dy, dx in _make_shift_groups(out_channels):
        k[cs:ce, dy + 1, dx + 1] = 1.0
    return jnp.asarray(k)


def _shift3x3_kernel(x_ref, o_ref, *, H, W, groups):
    # x_ref, o_ref: (C, H*W) blocks in VMEM (one image per grid step; the
    # batch dim is squeezed out by the BlockSpec).  All slice offsets and the
    # column masks below are trace-time constants (the one-hot weight
    # structure is fully exploited at trace time).
    HW = H * W
    for cs, ce, dy, dx in groups:
        cg = ce - cs
        csl = pl.ds(cs, cg)                       # channel sub-block (sublanes)

        if dy == 0 and dx == 0:                   # centre tap: identity copy
            o_ref[csl, :] = x_ref[csl, :]
            continue

        # Flattened shift: out[c, p] = x[c, p + s] where valid, else 0.
        s = dy * W + dx
        p0 = max(-s, 0)                           # first output lane that receives data
        L = HW - abs(s)                           # contiguous covered span (>= HW - W - 1)

        # Source slice for output lanes [p0, p0 + L).
        val = x_ref[csl, pl.ds(p0 + s, L)]

        # Column validity (x + dx must stay in [0, W)); the row boundary is
        # already handled by the slice bounds / trailing zero strip.
        if dx != 0:
            pos = jax.lax.broadcasted_iota(jnp.int32, (1, L), 1) + p0
            col = pos % W
            ok = (col < (W - dx)) if dx > 0 else (col >= (-dx))
            val = jnp.where(ok, val, jnp.zeros_like(val))

        # One near-full-width store for the covered span ...
        o_ref[csl, pl.ds(p0, L)] = val
        # ... plus one tiny zero strip (<= W+1 lanes) for the lanes whose
        # source falls entirely outside the image (all row/col-invalid).
        if s > 0:
            o_ref[csl, pl.ds(HW - s, s)] = jnp.zeros((cg, s), o_ref.dtype)
        else:
            o_ref[csl, pl.ds(0, -s)] = jnp.zeros((cg, -s), o_ref.dtype)


@jax.jit
def shift3x3(x_nchw: jnp.ndarray) -> jnp.ndarray:
    """Forward pass of Shift3x3. NCHW in -> NCHW out (PyTorch layout preserved)."""
    N, C, H, W = x_nchw.shape
    HW = H * W
    groups = _make_shift_groups(C)
    kernel = functools.partial(_shift3x3_kernel, H=H, W=W, groups=groups)

    # Metadata-only under jit (contiguous trailing dims): makes H*W the lane dim.
    x_flat = x_nchw.reshape(N, C, HW)

    itemsize = jnp.dtype(x_nchw.dtype).itemsize
    tile_bytes = C * HW * itemsize
    # in + out tiles, double-buffered, plus slack for Mosaic internal scratch.
    needed = 4 * tile_bytes + (2 << 20)
    try:
        physical = int(pltpu.get_tpu_info().vmem_capacity_bytes)
    except Exception:
        physical = 64 << 20                       # smallest per-TC VMEM (v7x)
    vmem_limit = int(max(min(needed, (physical * 3) // 4), 16 << 20))

    out_flat = pl.pallas_call(
        kernel,
        out_shape=jax.ShapeDtypeStruct((N, C, HW), x_nchw.dtype),
        grid=(N,),
        in_specs=[pl.BlockSpec((None, C, HW), lambda n: (n, 0, 0))],
        out_specs=pl.BlockSpec((None, C, HW), lambda n: (n, 0, 0)),
        compiler_params=pltpu.CompilerParams(
            dimension_semantics=("parallel",),
            vmem_limit_bytes=vmem_limit),
        cost_estimate=pl.CostEstimate(
            flops=0,
            transcendentals=0,
            bytes_accessed=2 * N * C * HW * itemsize),
    )(x_flat)
    return out_flat.reshape(N, C, H, W)


if __name__ == "__main__":
    # C % 9 != 0 exercises the centre-tap remainder path as well as all 9 shifts.
    N, C, H, W = 2, 22, 16, 16
    x = jax.random.normal(jax.random.PRNGKey(0), (N, C, H, W), dtype=jnp.float32)

    out = jax.block_until_ready(shift3x3(x))
    assert out.shape == (N, C, H, W)

    # Reference: exactly the grouped conv the PyTorch module performs.
    w = make_shift3x3_weights(C)                       # (C, 3, 3)
    ref = jax.lax.conv_general_dilated(
        x, w[:, None, :, :],
        window_strides=(1, 1), padding=((1, 1), (1, 1)),
        feature_group_count=C,
        dimension_numbers=("NCHW", "OIHW", "NCHW"))
    np.testing.assert_allclose(np.asarray(out), np.asarray(ref), atol=1e-6, rtol=1e-6)

    print("KERNEL_OK")
</pallas_src>

<mosaic_0001>
module attributes {stable_mosaic.version = 11 : i64} {
  func.func @_shift3x3_kernel(%arg0: i32, %arg1: memref<1x22x256xf32, #tpu.memory_space<vmem>>, %arg2: memref<1x22x256xf32, #tpu.memory_space<vmem>>) attributes {dimension_semantics = [#tpu.dimension_semantics<parallel>], iteration_bounds = array<i64: 2>, scalar_prefetch = 0 : i64, scratch_operands = 0 : i64, tpu.core_type = #tpu.core_type<tc>, window_params = [{transform_indices = @transform_0, window_bounds = array<i64: 1, 22, 256>}, {transform_indices = @transform_1, window_bounds = array<i64: 1, 22, 256>}]} {
    %c0 = arith.constant 0 : index
    %c0_0 = arith.constant 0 : index
    %c0_1 = arith.constant 0 : index
    %0 = vector.load %arg1[%c0, %c0_0, %c0_1] : memref<1x22x256xf32, #tpu.memory_space<vmem>>, vector<1x2x239xf32>
    %1 = vector.shape_cast %0 : vector<1x2x239xf32> to vector<2x239xf32>
    %2 = tpu.iota {dimensions = array<i32: 1>} : vector<1x239xi32>
    %c17_i32 = arith.constant 17 : i32
    %3 = vector.broadcast %c17_i32 : i32 to vector<1x239xi32>
    %4 = arith.addi %2, %3 : vector<1x239xi32>
    %c16_i32 = arith.constant 16 : i32
    %c0_i32 = arith.constant 0 : i32
    %5 = arith.cmpi eq, %c16_i32, %c0_i32 : i32
    %c1_i32 = arith.constant 1 : i32
    %6 = arith.select %5, %c1_i32, %c16_i32 : i32
    %7 = vector.broadcast %6 : i32 to vector<1x239xi32>
    %8 = arith.remsi %4, %7 : vector<1x239xi32>
    %c0_i32_2 = arith.constant 0 : i32
    %9 = vector.broadcast %c0_i32_2 : i32 to vector<1x239xi32>
    %10 = arith.cmpi ne, %8, %9 : vector<1x239xi32>
    %c0_i32_3 = arith.constant 0 : i32
    %11 = vector.broadcast %c0_i32_3 : i32 to vector<1x239xi32>
    %12 = arith.cmpi slt, %8, %11 : vector<1x239xi32>
    %c0_i32_4 = arith.constant 0 : i32
    %13 = arith.cmpi slt, %6, %c0_i32_4 : i32
    %14 = vector.broadcast %13 : i1 to vector<1x239xi1>
    %15 = vector.broadcast %14 : vector<1x239xi1> to vector<1x239xi1>
    %16 = arith.xori %12, %15 : vector<1x239xi1>
    %17 = arith.andi %16, %10 : vector<1x239xi1>
    %18 = vector.broadcast %6 : i32 to vector<1x239xi32>
    %19 = arith.addi %8, %18 : vector<1x239xi32>
    %20 = arith.select %17, %19, %8 : vector<1x239xi1>, vector<1x239xi32>
    %c1_i32_5 = arith.constant 1 : i32
    %21 = vector.broadcast %c1_i32_5 : i32 to vector<1x239xi32>
    %22 = arith.cmpi sge, %20, %21 : vector<1x239xi32>
    %cst = arith.constant 0.000000e+00 : f32
    %23 = vector.broadcast %cst : f32 to vector<2x239xf32>
    %24 = vector.shape_cast %22 : vector<1x239xi1> to vector<1x239xi1>
    %25 = vector.broadcast %24 : vector<1x239xi1> to vector<2x239xi1>
    %26 = arith.select %25, %1, %23 : vector<2x239xi1>, vector<2x239xf32>
    %c0_6 = arith.constant 0 : index
    %c0_7 = arith.constant 0 : index
    %c17 = arith.constant 17 : index
    %27 = vector.load %arg2[%c0_6, %c0_7, %c17] : memref<1x22x256xf32, #tpu.memory_space<vmem>>, vector<1x2x239xf32>
    %28 = vector.shape_cast %27 : vector<1x2x239xf32> to vector<2x239xf32>
    %29 = vector.shape_cast %26 : vector<2x239xf32> to vector<1x2x239xf32>
    tpu.vector_store %arg2[%c0_6, %c0_7, %c17], %29 {strides = array<i32>} : memref<1x22x256xf32, #tpu.memory_space<vmem>>, vector<1x2x239xf32>,
    %cst_8 = arith.constant 0.000000e+00 : f32
    %30 = vector.broadcast %cst_8 : f32 to vector<2x17xf32>
    %c0_9 = arith.constant 0 : index
    %c0_10 = arith.constant 0 : index
    %c0_11 = arith.constant 0 : index
    %31 = vector.load %arg2[%c0_9, %c0_10, %c0_11] : memref<1x22x256xf32, #tpu.memory_space<vmem>>, vector<1x2x17xf32>
    %32 = vector.shape_cast %31 : vector<1x2x17xf32> to vector<2x17xf32>
    %33 = vector.shape_cast %30 : vector<2x17xf32> to vector<1x2x17xf32>
    tpu.vector_store %arg2[%c0_9, %c0_10, %c0_11], %33 {strides = array<i32>} : memref<1x22x256xf32, #tpu.memory_space<vmem>>, vector<1x2x17xf32>,
    %c0_12 = arith.constant 0 : index
    %c2 = arith.constant 2 : index
    %c0_13 = arith.constant 0 : index
    %34 = vector.load %arg1[%c0_12, %c2, %c0_13] : memref<1x22x256xf32, #tpu.memory_space<vmem>>, vector<1x2x240xf32>
    %35 = vector.shape_cast %34 : vector<1x2x240xf32> to vector<2x240xf32>
    %c0_14 = arith.constant 0 : index
    %c2_15 = arith.constant 2 : index
    %c16 = arith.constant 16 : index
    %36 = vector.load %arg2[%c0_14, %c2_15, %c16] : memref<1x22x256xf32, #tpu.memory_space<vmem>>, vector<1x2x240xf32>
    %37 = vector.shape_cast %36 : vector<1x2x240xf32> to vector<2x240xf32>
    %38 = vector.shape_cast %35 : vector<2x240xf32> to vector<1x2x240xf32>
    tpu.vector_store %arg2[%c0_14, %c2_15, %c16], %38 {strides = array<i32>} : memref<1x22x256xf32, #tpu.memory_space<vmem>>, vector<1x2x240xf32>,
    %cst_16 = arith.constant 0.000000e+00 : f32
    %39 = vector.broadcast %cst_16 : f32 to vector<2x16xf32>
    %c0_17 = arith.constant 0 : index
    %c2_18 = arith.constant 2 : index
    %c0_19 = arith.constant 0 : index
    %40 = vector.load %arg2[%c0_17, %c2_18, %c0_19] : memref<1x22x256xf32, #tpu.memory_space<vmem>>, vector<1x2x16xf32>
    %41 = vector.shape_cast %40 : vector<1x2x16xf32> to vector<2x16xf32>
    %42 = vector.shape_cast %39 : vector<2x16xf32> to vector<1x2x16xf32>
    tpu.vector_store %arg2[%c0_17, %c2_18, %c0_19], %42 {strides = array<i32>} : memref<1x22x256xf32, #tpu.memory_space<vmem>>, vector<1x2x16xf32>,
    %c0_20 = arith.constant 0 : index
    %c4 = arith.constant 4 : index
    %c0_21 = arith.constant 0 : index
    %43 = vector.load %arg1[%c0_20, %c4, %c0_21] : memref<1x22x256xf32, #tpu.memory_space<vmem>>, vector<1x2x241xf32>
    %44 = vector.shape_cast %43 : vector<1x2x241xf32> to vector<2x241xf32>
    %45 = tpu.iota {dimensions = array<i32: 1>} : vector<1x241xi32>
    %c15_i32 = arith.constant 15 : i32
    %46 = vector.broadcast %c15_i32 : i32 to vector<1x241xi32>
    %47 = arith.addi %45, %46 : vector<1x241xi32>
    %c16_i32_22 = arith.constant 16 : i32
    %c0_i32_23 = arith.constant 0 : i32
    %48 = arith.cmpi eq, %c16_i32_22, %c0_i32_23 : i32
    %c1_i32_24 = arith.constant 1 : i32
    %49 = arith.select %48, %c1_i32_24, %c16_i32_22 : i32
    %50 = vector.broadcast %49 : i32 to vector<1x241xi32>
    %51 = arith.remsi %47, %50 : vector<1x241xi32>
    %c0_i32_25 = arith.constant 0 : i32
    %52 = vector.broadcast %c0_i32_25 : i32 to vector<1x241xi32>
    %53 = arith.cmpi ne, %51, %52 : vector<1x241xi32>
    %c0_i32_26 = arith.constant 0 : i32
    %54 = vector.broadcast %c0_i32_26 : i32 to vector<1x241xi32>
    %55 = arith.cmpi slt, %51, %54 : vector<1x241xi32>
    %c0_i32_27 = arith.constant 0 : i32
    %56 = arith.cmpi slt, %49, %c0_i32_27 : i32
    %57 = vector.broadcast %56 : i1 to vector<1x241xi1>
    %58 = vector.broadcast %57 : vector<1x241xi1> to vector<1x241xi1>
    %59 = arith.xori %55, %58 : vector<1x241xi1>
    %60 = arith.andi %59, %53 : vector<1x241xi1>
    %61 = vector.broadcast %49 : i32 to vector<1x241xi32>
    %62 = arith.addi %51, %61 : vector<1x241xi32>
    %63 = arith.select %60, %62, %51 : vector<1x241xi1>, vector<1x241xi32>
    %c15_i32_28 = arith.constant 15 : i32
    %64 = vector.broadcast %c15_i32_28 : i32 to vector<1x241xi32>
    %65 = arith.cmpi slt, %63, %64 : vector<1x241xi32>
    %cst_29 = arith.constant 0.000000e+00 : f32
    %66 = vector.broadcast %cst_29 : f32 to vector<2x241xf32>
    %67 = vector.shape_cast %65 : vector<1x241xi1> to vector<1x241xi1>
    %68 = vector.broadcast %67 : vector<1x241xi1> to vector<2x241xi1>
    %69 = arith.select %68, %44, %66 : vector<2x241xi1>, vector<2x241xf32>
    %c0_30 = arith.constant 0 : index
    %c4_31 = arith.constant 4 : index
    %c15 = arith.constant 15 : index
    %70 = vector.load %arg2[%c0_30, %c4_31, %c15] : memref<1x22x256xf32, #tpu.memory_space<vmem>>, vector<1x2x241xf32>
    %71 = vector.shape_cast %70 : vector<1x2x241xf32> to vector<2x241xf32>
    %72 = vector.shape_cast %69 : vector<2x241xf32> to vector<1x2x241xf32>
    tpu.vector_store %arg2[%c0_30, %c4_31, %c15], %72 {strides = array<i32>} : memref<1x22x256xf32, #tpu.memory_space<vmem>>, vector<1x2x241xf32>,
    %cst_32 = arith.constant 0.000000e+00 : f32
    %73 = vector.broadcast %cst_32 : f32 to vector<2x15xf32>
    %c0_33 = arith.constant 0 : index
    %c4_34 = arith.constant 4 : index
    %c0_35 = arith.constant 0 : index
    %74 = vector.load %arg2[%c0_33, %c4_34, %c0_35] : memref<1x22x256xf32, #tpu.memory_space<vmem>>, vector<1x2x15xf32>
    %75 = vector.shape_cast %74 : vector<1x2x15xf32> to vector<2x15xf32>
    %76 = vector.shape_cast %73 : vector<2x15xf32> to vector<1x2x15xf32>
    tpu.vector_store %arg2[%c0_33, %c4_34, %c0_35], %76 {strides = array<i32>} : memref<1x22x256xf32, #tpu.memory_space<vmem>>, vector<1x2x15xf32>,
    %c0_36 = arith.constant 0 : index
    %c6 = arith.constant 6 : index
    %c0_37 = arith.constant 0 : index
    %77 = vector.load %arg1[%c0_36, %c6, %c0_37] : memref<1x22x256xf32, #tpu.memory_space<vmem>>, vector<1x2x255xf32>
    %78 = vector.shape_cast %77 : vector<1x2x255xf32> to vector<2x255xf32>
    %79 = tpu.iota {dimensions = array<i32: 1>} : vector<1x255xi32>
    %c1_i32_38 = arith.constant 1 : i32
    %80 = vector.broadcast %c1_i32_38 : i32 to vector<1x255xi32>
    %81 = arith.addi %79, %80 : vector<1x255xi32>
    %c16_i32_39 = arith.constant 16 : i32
    %c0_i32_40 = arith.constant 0 : i32
    %82 = arith.cmpi eq, %c16_i32_39, %c0_i32_40 : i32
    %c1_i32_41 = arith.constant 1 : i32
    %83 = arith.select %82, %c1_i32_41, %c16_i32_39 : i32
    %84 = vector.broadcast %83 : i32 to vector<1x255xi32>
    %85 = arith.remsi %81, %84 : vector<1x255xi32>
    %c0_i32_42 = arith.constant 0 : i32
    %86 = vector.broadcast %c0_i32_42 : i32 to vector<1x255xi32>
    %87 = arith.cmpi ne, %85, %86 : vector<1x255xi32>
    %c0_i32_43 = arith.constant 0 : i32
    %88 = vector.broadcast %c0_i32_43 : i32 to vector<1x255xi32>
    %89 = arith.cmpi slt, %85, %88 : vector<1x255xi32>
    %c0_i32_44 = arith.constant 0 : i32
    %90 = arith.cmpi slt, %83, %c0_i32_44 : i32
    %91 = vector.broadcast %90 : i1 to vector<1x255xi1>
    %92 = vector.broadcast %91 : vector<1x255xi1> to vector<1x255xi1>
    %93 = arith.xori %89, %92 : vector<1x255xi1>
    %94 = arith.andi %93, %87 : vector<1x255xi1>
    %95 = vector.broadcast %83 : i32 to vector<1x255xi32>
    %96 = arith.addi %85, %95 : vector<1x255xi32>
    %97 = arith.select %94, %96, %85 : vector<1x255xi1>, vector<1x255xi32>
    %c1_i32_45 = arith.constant 1 : i32
    %98 = vector.broadcast %c1_i32_45 : i32 to vector<1x255xi32>
    %99 = arith.cmpi sge, %97, %98 : vector<1x255xi32>
    %cst_46 = arith.constant 0.000000e+00 : f32
    %100 = vector.broadcast %cst_46 : f32 to vector<2x255xf32>
    %101 = vector.shape_cast %99 : vector<1x255xi1> to vector<1x255xi1>
    %102 = vector.broadcast %101 : vector<1x255xi1> to vector<2x255xi1>
    %103 = arith.select %102, %78, %100 : vector<2x255xi1>, vector<2x255xf32>
    %c0_47 = arith.constant 0 : index
    %c6_48 = arith.constant 6 : index
    %c1 = arith.constant 1 : index
    %104 = vector.load %arg2[%c0_47, %c6_48, %c1] : memref<1x22x256xf32, #tpu.memory_space<vmem>>, vector<1x2x255xf32>
    %105 = vector.shape_cast %104 : vector<1x2x255xf32> to vector<2x255xf32>
    %106 = vector.shape_cast %103 : vector<2x255xf32> to vector<1x2x255xf32>
    tpu.vector_store %arg2[%c0_47, %c6_48, %c1], %106 {strides = array<i32>} : memref<1x22x256xf32, #tpu.memory_space<vmem>>, vector<1x2x255xf32>,
    %cst_49 = arith.constant 0.000000e+00 : f32
    %107 = vector.broadcast %cst_49 : f32 to vector<2x1xf32>
    %c0_50 = arith.constant 0 : index
    %c6_51 = arith.constant 6 : index
    %c0_52 = arith.constant 0 : index
    %108 = vector.load %arg2[%c0_50, %c6_51, %c0_52] : memref<1x22x256xf32, #tpu.memory_space<vmem>>, vector<1x2x1xf32>
    %109 = vector.shape_cast %108 : vector<1x2x1xf32> to vector<2x1xf32>
    %110 = vector.shape_cast %107 : vector<2x1xf32> to vector<1x2x1xf32>
    tpu.vector_store %arg2[%c0_50, %c6_51, %c0_52], %110 {strides = array<i32>} : memref<1x22x256xf32, #tpu.memory_space<vmem>>, vector<1x2x1xf32>,
    %c0_53 = arith.constant 0 : index
    %c8 = arith.constant 8 : index
    %c0_54 = arith.constant 0 : index
    %111 = vector.load %arg1[%c0_53, %c8, %c0_54] : memref<1x22x256xf32, #tpu.memory_space<vmem>>, vector<1x6x256xf32>
    %112 = vector.shape_cast %111 : vector<1x6x256xf32> to vector<6x256xf32>
    %c0_55 = arith.constant 0 : index
    %c8_56 = arith.constant 8 : index
    %c0_57 = arith.constant 0 : index
    %113 = vector.load %arg2[%c0_55, %c8_56, %c0_57] : memref<1x22x256xf32, #tpu.memory_space<vmem>>, vector<1x6x256xf32>
    %114 = vector.shape_cast %113 : vector<1x6x256xf32> to vector<6x256xf32>
    %115 = vector.shape_cast %112 : vector<6x256xf32> to vector<1x6x256xf32>
    tpu.vector_store %arg2[%c0_55, %c8_56, %c0_57], %115 {strides = array<i32>} : memref<1x22x256xf32, #tpu.memory_space<vmem>>, vector<1x6x256xf32>,
    %c0_58 = arith.constant 0 : index
    %c14 = arith.constant 14 : index
    %c1_59 = arith.constant 1 : index
    %116 = vector.load %arg1[%c0_58, %c14, %c1_59] : memref<1x22x256xf32, #tpu.memory_space<vmem>>, vector<1x2x255xf32>
    %117 = vector.shape_cast %116 : vector<1x2x255xf32> to vector<2x255xf32>
    %118 = tpu.iota {dimensions = array<i32: 1>} : vector<1x255xi32>
    %c0_i32_60 = arith.constant 0 : i32
    %119 = vector.broadcast %c0_i32_60 : i32 to vector<1x255xi32>
    %120 = arith.addi %118, %119 : vector<1x255xi32>
    %c16_i32_61 = arith.constant 16 : i32
    %c0_i32_62 = arith.constant 0 : i32
    %121 = arith.cmpi eq, %c16_i32_61, %c0_i32_62 : i32
    %c1_i32_63 = arith.constant 1 : i32
    %122 = arith.select %121, %c1_i32_63, %c16_i32_61 : i32
    %123 = vector.broadcast %122 : i32 to vector<1x255xi32>
    %124 = arith.remsi %120, %123 : vector<1x255xi32>
    %c0_i32_64 = arith.constant 0 : i32
    %125 = vector.broadcast %c0_i32_64 : i32 to vector<1x255xi32>
    %126 = arith.cmpi ne, %124, %125 : vector<1x255xi32>
    %c0_i32_65 = arith.constant 0 : i32
    %127 = vector.broadcast %c0_i32_65 : i32 to vector<1x255xi32>
    %128 = arith.cmpi slt, %124, %127 : vector<1x255xi32>
    %c0_i32_66 = arith.constant 0 : i32
    %129 = arith.cmpi slt, %122, %c0_i32_66 : i32
    %130 = vector.broadcast %129 : i1 to vector<1x255xi1>
    %131 = vector.broadcast %130 : vector<1x255xi1> to vector<1x255xi1>
    %132 = arith.xori %128, %131 : vector<1x255xi1>
    %133 = arith.andi %132, %126 : vector<1x255xi1>
    %134 = vector.broadcast %122 : i32 to vector<1x255xi32>
    %135 = arith.addi %124, %134 : vector<1x255xi32>
    %136 = arith.select %133, %135, %124 : vector<1x255xi1>, vector<1x255xi32>
    %c15_i32_67 = arith.constant 15 : i32
    %137 = vector.broadcast %c15_i32_67 : i32 to vector<1x255xi32>
    %138 = arith.cmpi slt, %136, %137 : vector<1x255xi32>
    %cst_68 = arith.constant 0.000000e+00 : f32
    %139 = vector.broadcast %cst_68 : f32 to vector<2x255xf32>
    %140 = vector.shape_cast %138 : vector<1x255xi1> to vector<1x255xi1>
    %141 = vector.broadcast %140 : vector<1x255xi1> to vector<2x255xi1>
    %142 = arith.select %141, %117, %139 : vector<2x255xi1>, vector<2x255xf32>
    %c0_69 = arith.constant 0 : index
    %c14_70 = arith.constant 14 : index
    %c0_71 = arith.constant 0 : index
    %143 = vector.load %arg2[%c0_69, %c14_70, %c0_71] : memref<1x22x256xf32, #tpu.memory_space<vmem>>, vector<1x2x255xf32>
    %144 = vector.shape_cast %143 : vector<1x2x255xf32> to vector<2x255xf32>
    %145 = vector.shape_cast %142 : vector<2x255xf32> to vector<1x2x255xf32>
    tpu.vector_store %arg2[%c0_69, %c14_70, %c0_71], %145 {strides = array<i32>} : memref<1x22x256xf32, #tpu.memory_space<vmem>>, vector<1x2x255xf32>,
    %cst_72 = arith.constant 0.000000e+00 : f32
    %146 = vector.broadcast %cst_72 : f32 to vector<2x1xf32>
    %c0_73 = arith.constant 0 : index
    %c14_74 = arith.constant 14 : index
    %c255 = arith.constant 255 : index
    %147 = vector.load %arg2[%c0_73, %c14_74, %c255] : memref<1x22x256xf32, #tpu.memory_space<vmem>>, vector<1x2x1xf32>
    %148 = vector.shape_cast %147 : vector<1x2x1xf32> to vector<2x1xf32>
    %149 = vector.shape_cast %146 : vector<2x1xf32> to vector<1x2x1xf32>
    tpu.vector_store %arg2[%c0_73, %c14_74, %c255], %149 {strides = array<i32>} : memref<1x22x256xf32, #tpu.memory_space<vmem>>, vector<1x2x1xf32>,
    %c0_75 = arith.constant 0 : index
    %c16_76 = arith.constant 16 : index
    %c15_77 = arith.constant 15 : index
    %150 = vector.load %arg1[%c0_75, %c16_76, %c15_77] : memref<1x22x256xf32, #tpu.memory_space<vmem>>, vector<1x2x241xf32>
    %151 = vector.shape_cast %150 : vector<1x2x241xf32> to vector<2x241xf32>
    %152 = tpu.iota {dimensions = array<i32: 1>} : vector<1x241xi32>
    %c0_i32_78 = arith.constant 0 : i32
    %153 = vector.broadcast %c0_i32_78 : i32 to vector<1x241xi32>
    %154 = arith.addi %152, %153 : vector<1x241xi32>
    %c16_i32_79 = arith.constant 16 : i32
    %c0_i32_80 = arith.constant 0 : i32
    %155 = arith.cmpi eq, %c16_i32_79, %c0_i32_80 : i32
    %c1_i32_81 = arith.constant 1 : i32
    %156 = arith.select %155, %c1_i32_81, %c16_i32_79 : i32
    %157 = vector.broadcast %156 : i32 to vector<1x241xi32>
    %158 = arith.remsi %154, %157 : vector<1x241xi32>
    %c0_i32_82 = arith.constant 0 : i32
    %159 = vector.broadcast %c0_i32_82 : i32 to vector<1x241xi32>
    %160 = arith.cmpi ne, %158, %159 : vector<1x241xi32>
    %c0_i32_83 = arith.constant 0 : i32
    %161 = vector.broadcast %c0_i32_83 : i32 to vector<1x241xi32>
    %162 = arith.cmpi slt, %158, %161 : vector<1x241xi32>
    %c0_i32_84 = arith.constant 0 : i32
    %163 = arith.cmpi slt, %156, %c0_i32_84 : i32
    %164 = vector.broadcast %163 : i1 to vector<1x241xi1>
    %165 = vector.broadcast %164 : vector<1x241xi1> to vector<1x241xi1>
    %166 = arith.xori %162, %165 : vector<1x241xi1>
    %167 = arith.andi %166, %160 : vector<1x241xi1>
    %168 = vector.broadcast %156 : i32 to vector<1x241xi32>
    %169 = arith.addi %158, %168 : vector<1x241xi32>
    %170 = arith.select %167, %169, %158 : vector<1x241xi1>, vector<1x241xi32>
    %c1_i32_85 = arith.constant 1 : i32
    %171 = vector.broadcast %c1_i32_85 : i32 to vector<1x241xi32>
    %172 = arith.cmpi sge, %170, %171 : vector<1x241xi32>
    %cst_86 = arith.constant 0.000000e+00 : f32
    %173 = vector.broadcast %cst_86 : f32 to vector<2x241xf32>
    %174 = vector.shape_cast %172 : vector<1x241xi1> to vector<1x241xi1>
    %175 = vector.broadcast %174 : vector<1x241xi1> to vector<2x241xi1>
    %176 = arith.select %175, %151, %173 : vector<2x241xi1>, vector<2x241xf32>
    %c0_87 = arith.constant 0 : index
    %c16_88 = arith.constant 16 : index
    %c0_89 = arith.constant 0 : index
    %177 = vector.load %arg2[%c0_87, %c16_88, %c0_89] : memref<1x22x256xf32, #tpu.memory_space<vmem>>, vector<1x2x241xf32>
    %178 = vector.shape_cast %177 : vector<1x2x241xf32> to vector<2x241xf32>
    %179 = vector.shape_cast %176 : vector<2x241xf32> to vector<1x2x241xf32>
    tpu.vector_store %arg2[%c0_87, %c16_88, %c0_89], %179 {strides = array<i32>} : memref<1x22x256xf32, #tpu.memory_space<vmem>>, vector<1x2x241xf32>,
    %cst_90 = arith.constant 0.000000e+00 : f32
    %180 = vector.broadcast %cst_90 : f32 to vector<2x15xf32>
    %c0_91 = arith.constant 0 : index
    %c16_92 = arith.constant 16 : index
    %c241 = arith.constant 241 : index
    %181 = vector.load %arg2[%c0_91, %c16_92, %c241] : memref<1x22x256xf32, #tpu.memory_space<vmem>>, vector<1x2x15xf32>
    %182 = vector.shape_cast %181 : vector<1x2x15xf32> to vector<2x15xf32>
    %183 = vector.shape_cast %180 : vector<2x15xf32> to vector<1x2x15xf32>
    tpu.vector_store %arg2[%c0_91, %c16_92, %c241], %183 {strides = array<i32>} : memref<1x22x256xf32, #tpu.memory_space<vmem>>, vector<1x2x15xf32>,
    %c0_93 = arith.constant 0 : index
    %c18 = arith.constant 18 : index
    %c16_94 = arith.constant 16 : index
    %184 = vector.load %arg1[%c0_93, %c18, %c16_94] : memref<1x22x256xf32, #tpu.memory_space<vmem>>, vector<1x2x240xf32>
    %185 = vector.shape_cast %184 : vector<1x2x240xf32> to vector<2x240xf32>
    %c0_95 = arith.constant 0 : index
    %c18_96 = arith.constant 18 : index
    %c0_97 = arith.constant 0 : index
    %186 = vector.load %arg2[%c0_95, %c18_96, %c0_97] : memref<1x22x256xf32, #tpu.memory_space<vmem>>, vector<1x2x240xf32>
    %187 = vector.shape_cast %186 : vector<1x2x240xf32> to vector<2x240xf32>
    %188 = vector.shape_cast %185 : vector<2x240xf32> to vector<1x2x240xf32>
    tpu.vector_store %arg2[%c0_95, %c18_96, %c0_97], %188 {strides = array<i32>} : memref<1x22x256xf32, #tpu.memory_space<vmem>>, vector<1x2x240xf32>,
    %cst_98 = arith.constant 0.000000e+00 : f32
    %189 = vector.broadcast %cst_98 : f32 to vector<2x16xf32>
    %c0_99 = arith.constant 0 : index
    %c18_100 = arith.constant 18 : index
    %c240 = arith.constant 240 : index
    %190 = vector.load %arg2[%c0_99, %c18_100, %c240] : memref<1x22x256xf32, #tpu.memory_space<vmem>>, vector<1x2x16xf32>
    %191 = vector.shape_cast %190 : vector<1x2x16xf32> to vector<2x16xf32>
    %192 = vector.shape_cast %189 : vector<2x16xf32> to vector<1x2x16xf32>
    tpu.vector_store %arg2[%c0_99, %c18_100, %c240], %192 {strides = array<i32>} : memref<1x22x256xf32, #tpu.memory_space<vmem>>, vector<1x2x16xf32>,
    %c0_101 = arith.constant 0 : index
    %c20 = arith.constant 20 : index
    %c17_102 = arith.constant 17 : index
    %193 = vector.load %arg1[%c0_101, %c20, %c17_102] : memref<1x22x256xf32, #tpu.memory_space<vmem>>, vector<1x2x239xf32>
    %194 = vector.shape_cast %193 : vector<1x2x239xf32> to vector<2x239xf32>
    %195 = tpu.iota {dimensions = array<i32: 1>} : vector<1x239xi32>
    %c0_i32_103 = arith.constant 0 : i32
    %196 = vector.broadcast %c0_i32_103 : i32 to vector<1x239xi32>
    %197 = arith.addi %195, %196 : vector<1x239xi32>
    %c16_i32_104 = arith.constant 16 : i32
    %c0_i32_105 = arith.constant 0 : i32
    %198 = arith.cmpi eq, %c16_i32_104, %c0_i32_105 : i32
    %c1_i32_106 = arith.constant 1 : i32
    %199 = arith.select %198, %c1_i32_106, %c16_i32_104 : i32
    %200 = vector.broadcast %199 : i32 to vector<1x239xi32>
    %201 = arith.remsi %197, %200 : vector<1x239xi32>
    %c0_i32_107 = arith.constant 0 : i32
    %202 = vector.broadcast %c0_i32_107 : i32 to vector<1x239xi32>
    %203 = arith.cmpi ne, %201, %202 : vector<1x239xi32>
    %c0_i32_108 = arith.constant 0 : i32
    %204 = vector.broadcast %c0_i32_108 : i32 to vector<1x239xi32>
    %205 = arith.cmpi slt, %201, %204 : vector<1x239xi32>
    %c0_i32_109 = arith.constant 0 : i32
    %206 = arith.cmpi slt, %199, %c0_i32_109 : i32
    %207 = vector.broadcast %206 : i1 to vector<1x239xi1>
    %208 = vector.broadcast %207 : vector<1x239xi1> to vector<1x239xi1>
    %209 = arith.xori %205, %208 : vector<1x239xi1>
    %210 = arith.andi %209, %203 : vector<1x239xi1>
    %211 = vector.broadcast %199 : i32 to vector<1x239xi32>
    %212 = arith.addi %201, %211 : vector<1x239xi32>
    %213 = arith.select %210, %212, %201 : vector<1x239xi1>, vector<1x239xi32>
    %c15_i32_110 = arith.constant 15 : i32
    %214 = vector.broadcast %c15_i32_110 : i32 to vector<1x239xi32>
    %215 = arith.cmpi slt, %213, %214 : vector<1x239xi32>
    %cst_111 = arith.constant 0.000000e+00 : f32
    %216 = vector.broadcast %cst_111 : f32 to vector<2x239xf32>
    %217 = vector.shape_cast %215 : vector<1x239xi1> to vector<1x239xi1>
    %218 = vector.broadcast %217 : vector<1x239xi1> to vector<2x239xi1>
    %219 = arith.select %218, %194, %216 : vector<2x239xi1>, vector<2x239xf32>
    %c0_112 = arith.constant 0 : index
    %c20_113 = arith.constant 20 : index
    %c0_114 = arith.constant 0 : index
    %220 = vector.load %arg2[%c0_112, %c20_113, %c0_114] : memref<1x22x256xf32, #tpu.memory_space<vmem>>, vector<1x2x239xf32>
    %221 = vector.shape_cast %220 : vector<1x2x239xf32> to vector<2x239xf32>
    %222 = vector.shape_cast %219 : vector<2x239xf32> to vector<1x2x239xf32>
    tpu.vector_store %arg2[%c0_112, %c20_113, %c0_114], %222 {strides = array<i32>} : memref<1x22x256xf32, #tpu.memory_space<vmem>>, vector<1x2x239xf32>,
    %cst_115 = arith.constant 0.000000e+00 : f32
    %223 = vector.broadcast %cst_115 : f32 to vector<2x17xf32>
    %c0_116 = arith.constant 0 : index
    %c20_117 = arith.constant 20 : index
    %c239 = arith.constant 239 : index
    %224 = vector.load %arg2[%c0_116, %c20_117, %c239] : memref<1x22x256xf32, #tpu.memory_space<vmem>>, vector<1x2x17xf32>
    %225 = vector.shape_cast %224 : vector<1x2x17xf32> to vector<2x17xf32>
    %226 = vector.shape_cast %223 : vector<2x17xf32> to vector<1x2x17xf32>
    tpu.vector_store %arg2[%c0_116, %c20_117, %c239], %226 {strides = array<i32>} : memref<1x22x256xf32, #tpu.memory_space<vmem>>, vector<1x2x17xf32>,
    return
  }
  func.func @transform_0(%arg0: i32) -> (i32, i32, i32) {
    %c0_i32 = arith.constant 0 : i32
    %c0_i32_0 = arith.constant 0 : i32
    %c0_i32_1 = arith.constant 0 : i32
    return %arg0, %c0_i32, %c0_i32_0 : i32, i32, i32
  }
  func.func @transform_1(%arg0: i32) -> (i32, i32, i32) {
    %c0_i32 = arith.constant 0 : i32
    %c0_i32_0 = arith.constant 0 : i32
    %c0_i32_1 = arith.constant 0 : i32
    return %arg0, %c0_i32, %c0_i32_0 : i32, i32, i32
  }
}

</mosaic_0001>

<bundles_post_ra>
// kernel: shift3x3.1
= control target key start
LH: loop header
LB: loop body
LE: loop exit
PB: predicated region body
PF: predicated region fallthrough
CT: control target
= control target key end

     0   :  { %s529_s6 = smov 0   ;;  %s636_s0 = inlined_call_operand.vmem [shape: f32[2,22,256], index: 0, kind: input, shape index: {}]   ;;  %s637_s1 = inlined_call_operand.vmem [shape: f32[2,22,256], index: 1, kind: output, shape index: {}]  }
   0x1 LB: > { %s475_s7 = sadd.s32 4294967295, %s508_s6   ;;  %p479_p0 = scmp.ge.s32.totalorder %s508_s6, 1  ;;  %s508_s6 = sphi %s529_s6, %s11_s6  }
   0x2   : > { %p87_p1 = scmp.lt.s32.totalorder %s508_s6, 3 }
   0x4   : > { %p88_p2 = pnand %p479_p0, %p87_p1 }
   0x5   : > { %p107_p3 = scmp.lt.s32.totalorder (!%p88_p2), %s475_s7, 1  ;;  %v119_v0 = vlaneseq (!%p88_p2)  ;;  %s510_s15 = smov (!%p88_p2), 113   ;;  %vm372_vm7 = vcmask (!%p88_p2), 918528   ;;  %vm365_vm8 = vcmask (!%p88_p2), 924672   ;;  %vm374_vm9 = vcmask (!%p88_p2), 1042312  }
   0x6   : > { %91 = sbr.rel (%p88_p2) target bundleno = 164 (0xa4), region = 24  ;;  %s511_s16 = smov (!%p88_p2), 111   ;;  %v518_v49 = vmov (!%p88_p2), 0.0   ;;  %vm403_vm12 = vcmask (!%p88_p2), 908288   ;;  %vm334_vm14 = vcmask (!%p88_p2), 1039360   ;;  %vm416_vm15 = vcmask (!%p88_p2), 906244  }
   0x7   : > { %v537_v1 = vand.u32 (!%p88_p2), 127, %v119_v0  ;;  %s512_s17 = smov (!%p88_p2), 127   ;;  %s513_s18 = smov (!%p88_p2), 17  }
   0x8   : > { %s514_s19 = smov (!%p88_p2), 16   ;;  %s515_s20 = smov (!%p88_p2), 15  }
   0x9   : > { %v540_v2 = vadd.s32 (!%p88_p2), 128, %v537_v1  ;;  %v122_v4 = vadd.s32 (!%p88_p2), 17, %v537_v1  ;;  %v190_v22 = vadd.s32 (!%p88_p2), 15, %v537_v1  ;;  %v241_v28 = vadd.s32 (!%p88_p2), 1, %v537_v1  ;;  %s516_s21 = smov (!%p88_p2), 1   ;;  %s517_s22 = smov (!%p88_p2), 112  }
   0xa   : > { %v300_v44 = vand.u32 (!%p88_p2), 15, %v537_v1 }
   0xb   : > { %v123_v3 = vadd.s32 (!%p88_p2), 17, %v540_v2  ;;  %v128_v16 = vand.u32 (!%p88_p2), 15, %v122_v4  ;;  %v191_v20 = vadd.s32 (!%p88_p2), 15, %v540_v2  ;;  %v242_v26 = vadd.s32 (!%p88_p2), 1, %v540_v2 }
   0xc   : > { %v196_v27 = vand.u32 (!%p88_p2), 15, %v190_v22  ;;  %v247_v34 = vand.u32 (!%p88_p2), 15, %v241_v28  ;;  %v307_v43 = vand.u32 (!%p88_p2), 15, %v540_v2  ;;  %vm353_vm10 = vcmp.ge.s32.totalorder (!%p88_p2), %v300_v44, 1 }
   0xd   : > { %s643_s7 = smov (!%p107_p3, %s475_s7), 1  ;;  %v135_v15 = vand.u32 15, %v123_v3  ;;  %vm148_vm1 = vcmp.ge.s32.totalorder %v128_v16, 1  ;;  %v203_v25 = vand.u32 15, %v191_v20  ;;  %v254_v32 = vand.u32 15, %v242_v26 }
   0xe   : > { %s484_s8 = smul.u32 48, %s643_s7  ;;  %vm216_vm3 = vcmp.lt.s32.totalorder %v196_v27, 15  ;;  %vm267_vm5 = vcmp.ge.s32.totalorder %v247_v34, 1  ;;  %vm354_vm6 = vcmp.ge.s32.totalorder %v307_v43, 1  ;;  %vm584_vm11 = vcmp.lt.s32.totalorder %v307_v43, 15 }
   0xf   : > { %vm149_vm0 = vcmp.ge.s32.totalorder %v135_v15, 1  ;;  %vm217_vm2 = vcmp.lt.s32.totalorder %v203_v25, 15  ;;  %vm268_vm4 = vcmp.ge.s32.totalorder %v254_v32, 1  ;;  %vm588_vm13 = vcmp.lt.s32.totalorder %v300_v44, 15 }
  0x10   : > { %s545_s11 = scalar_lea.vmem %s636_s0, %s484_s8  ;;  %s552_s14 = scalar_lea.vmem %s637_s1, %s484_s8 }
  0x11   : > { %v352_v5 = vld [vmem:[%s545_s11 + $0x28] sm:$0x3]  ;;  %v290_v6 = vld [vmem:[%s545_s11 + $0x10] sm:$0x3f]  ;;  %v291_v7 = vld [vmem:[%s545_s11 + $0x18] sm:$0x3f] }
  0x12   : > { %363 = vrot.lane.b32.xlu1 %v352_v5, %s510_s15  ;;  %292 = vst [vmem:[%s552_s14 + $0x10] sm:$0x3f] %v290_v6  ;;  %293 = vst [vmem:[%s552_s14 + $0x18] sm:$0x3f] %v291_v7  ;;  %v351_v8 = vld [vmem:[%s545_s11 + $0x20] sm:$0x3] }
  0x13   : > { %v393_v9 = vld [vmem:[%s545_s11 + $0x20] sm:$0x30]  ;;  %v294_v10 = vld [vmem:[%s545_s11 + $0x10] sm:$0xc0]  ;;  %361 = vrot.lane.b32.xlu0 %v351_v8, %s510_s15  ;;  %v394_v13 = vld [vmem:[%s545_s11 + $0x28] sm:$0x30] }
  0x14   : > { %v397_v11 = vrot.slane %v393_v9, 4  ;;  %v328_v12 = vrot.slane %v294_v10, 6  ;;  %v295_v14 = vld [vmem:[%s545_s11 + $0x18] sm:$0xc0]  ;;  %v398_v17 = vrot.slane %v394_v13, 4 }
  0x15   : > { %v329_v18 = vrot.slane %v295_v14, 6  ;;  %v118_v19 = vld [vmem:[%s545_s11 + $0x8] sm:$0x3]  ;;  %v117_v21 = vld [vmem:[%s545_s11] sm:$0x3] }
  0x16   : > { %399 = vrot.lane.b32.xlu1 %v397_v11, %s511_s16  ;;  %v155_v23 = vsel %vm149_vm0, %v118_v19, 0.0  ;;  %v154_v24 = vsel %vm148_vm1, %v117_v21, 0.0  ;;  %v172_v29 = vld [vmem:[%s545_s11 + $0x8] sm:$0xc]  ;;  %v171_v30 = vld [vmem:[%s545_s11] sm:$0xc] }
  0x17   : > { %330 = vrot.lane.b32.xlu0 %v328_v12, %s512_s17  ;;  %v189_v31 = vld [vmem:[%s545_s11 + $0x8] sm:$0x30]  ;;  %v188_v33 = vld [vmem:[%s545_s11] sm:$0x30]  ;;  %v240_v37 = vld [vmem:[%s545_s11 + $0x8] sm:$0xc0] }
  0x18   : > { %v223_v35 = vsel %vm217_vm2, %v189_v31, 0.0  ;;  %v222_v36 = vsel %vm216_vm3, %v188_v33, 0.0  ;;  %v239_v38 = vld [vmem:[%s545_s11] sm:$0xc0]  ;;  %v274_v39 = vsel %vm268_vm4, %v240_v37, 0.0  ;;  %vm418_vm0 = vcmask 1046396  }
  0x19   : > { %v273_v40 = vsel %vm267_vm5, %v239_v38, 0.0  ;;  %v377_v41 = vld [vmem:[%s545_s11 + $0x28] sm:$0xc]  ;;  %v376_v42 = vld [vmem:[%s545_s11 + $0x20] sm:$0xc]  ;;  %vm347_vm1 = vcmask 1039366  }
  0x1a   : > { %401 = vrot.lane.b32.xlu1 %v398_v17, %s511_s16  ;;  %vm349_vm2 = vcmask 1048574   ;;  %vm162_vm3 = vcmask 138240   ;;  %vm166_vm4 = vcmask 1041544   ;;  %vm169_vm5 = vcmask 132096  }
  0x1b   : > { %332 = vrot.lane.b32.xlu0 %v329_v18, %s512_s17 }
  0x1e   : > { %160 = vrot.lane.b32.xlu1 %v155_v23, %s513_s18 }
  0x1f   : > { %158 = vrot.lane.b32.xlu0 %v154_v24, %s513_s18 }
  0x22   : > { %177 = vrot.lane.b32.xlu1 %v172_v29, %s514_s19 }
  0x23   : > { %175 = vrot.lane.b32.xlu0 %v171_v30, %s514_s19 }
  0x26   : > { %228 = vrot.lane.b32.xlu1 %v223_v35, %s515_s20 }
  0x27   : > { %226 = vrot.lane.b32.xlu0 %v222_v36, %s515_s20 }
  0x2a   : > { %279 = vrot.lane.b32.xlu1 %v274_v39, %s516_s21 }
  0x2b   : > { %277 = vrot.lane.b32.xlu0 %v273_v40, %s516_s21 }
  0x2e   : > { %382 = vrot.lane.b32.xlu1 %v377_v41, %s517_s22 }
  0x2f   : > { %380 = vrot.lane.b32.xlu0 %v376_v42, %s517_s22 }
  0x84   : > { %v364_v45 = vpop.permute.xlu1 %363 }
  0x85   : > { %v370_v46 = vsel %vm354_vm6, %v364_v45, 0.0  ;;  %v362_v47 = vpop.permute.xlu0 %361  ;;  %vm179_vm6 = vcmask 130048  }
  0x86   : > { %373 = vst.msk [vmem:[%s552_s14 + $0x28] sm:$0x3] %vm372_vm7, %v370_v46  ;;  %v366_v48 = vsel %vm365_vm8, %v362_v47, %v364_v45  ;;  %vm183_vm7 = vcmask 1043586   ;;  %vm186_vm8 = vcmask 125954  }
  0x87   : > { %375 = vst.msk [vmem:[%s552_s14 + $0x28] sm:$0x3] %vm374_vm9, %v518_v49  ;;  %v369_v50 = vsel %vm353_vm10, %v366_v48, 0.0  ;;  %vm230_vm9 = vcmask 121856   ;;  %vm234_vm10 = vcmask 1045628  }
  0x88   : > { %371 = vst [vmem:[%s552_s14 + $0x20] sm:$0x3] %v369_v50  ;;  %v400_v51 = vpop.permute.xlu1 %399 }
  0x89   : > { %v331_v52 = vpop.permute.xlu0 %330 }
  0x8c   : > { %v402_v55 = vpop.permute.xlu1 %401 }
  0x8d   : > { %v404_v56 = vsel %vm403_vm12, %v400_v51, %v402_v55  ;;  %v408_v57 = vsel %vm584_vm11, %v402_v55, 0.0  ;;  %v333_v58 = vpop.permute.xlu0 %332  ;;  %vm281_vm12 = vcmask 7168  }
  0x8e   : > { %v407_v59 = vsel %vm588_vm13, %v404_v56, 0.0  ;;  %v412_v60 = vrot.slane %v408_v57, 4  ;;  %v335_v61 = vsel %vm334_vm14, %v331_v52, %v333_v58  ;;  %v339_v62 = vsel %vm584_vm11, %v333_v58, 0.0 }
  0x8f   : > { %v411_v63 = vrot.slane %v407_v59, 4  ;;  %v338_v0 = vsel %vm588_vm13, %v335_v61, 0.0  ;;  %v343_v1 = vrot.slane %v339_v62, 2  ;;  %vm237_vm11 = vcmask 119812  }
  0x90   : > { %417 = vst.msk [vmem:[%s552_s14 + $0x28] sm:$0x30] %vm416_vm15, %v412_v60  ;;  %v342_v2 = vrot.slane %v338_v0, 2  ;;  %v161_v3 = vpop.permute.xlu1 %160  ;;  %vm285_vm13 = vcmask 1047566   ;;  %vm288_vm14 = vcmask 7174   ;;  %vm389_vm15 = vcmask 912386  }
  0x91   : > { %415 = vst [vmem:[%s552_s14 + $0x20] sm:$0x30] %v411_v63  ;;  %419 = vst.msk [vmem:[%s552_s14 + $0x28] sm:$0x30] %vm418_vm0, %v518_v49  ;;  %v159_v4 = vpop.permute.xlu0 %158  ;;  %vm391_vm0 = vcmask 1044354  }
  0x92   : > { %348 = vst.msk [vmem:[%s552_s14 + $0x18] sm:$0xc0] %vm347_vm1, %v343_v1  ;;  %346 = vst [vmem:[%s552_s14 + $0x10] sm:$0xc0] %v342_v2  ;;  %v163_v5 = vsel %vm162_vm3, %v159_v4, %v161_v3  ;;  %vm384_vm1 = vcmask 916480  }
  0x93   : > { %350 = vst.msk [vmem:[%s552_s14 + $0x18] sm:$0xc0] %vm349_vm2, %v518_v49  ;;  %168 = vst [vmem:[%s552_s14 + $0x8] sm:$0x3] %v163_v5 }
  0x94   : > { %167 = vst.msk [vmem:[%s552_s14] sm:$0x3] %vm166_vm4, %v159_v4  ;;  %v178_v6 = vpop.permute.xlu1 %177 }
  0x95   : > { %170 = vst.msk [vmem:[%s552_s14] sm:$0x3] %vm169_vm5, %v518_v49  ;;  %v176_v7 = vpop.permute.xlu0 %175 }
  0x96   : > { %v180_v8 = vsel %vm179_vm6, %v176_v7, %v178_v6  ;;  %184 = vst.msk [vmem:[%s552_s14] sm:$0xc] %vm183_vm7, %v176_v7 }
  0x97   : > { %185 = vst [vmem:[%s552_s14 + $0x8] sm:$0xc] %v180_v8  ;;  %187 = vst.msk [vmem:[%s552_s14] sm:$0xc] %vm186_vm8, %v518_v49 }
  0x98   : > { %v229_v9 = vpop.permute.xlu1 %228 }
  0x99   : > { %v227_v10 = vpop.permute.xlu0 %226 }
  0x9a   : > { %v231_v11 = vsel %vm230_vm9, %v227_v10, %v229_v9  ;;  %235 = vst.msk [vmem:[%s552_s14] sm:$0x30] %vm234_vm10, %v227_v10 }
  0x9b   : > { %236 = vst [vmem:[%s552_s14 + $0x8] sm:$0x30] %v231_v11  ;;  %238 = vst.msk [vmem:[%s552_s14] sm:$0x30] %vm237_vm11, %v518_v49 }
  0x9c   : > { %v280_v12 = vpop.permute.xlu1 %279 }
  0x9d   : > { %v278_v13 = vpop.permute.xlu0 %277 }
  0x9e   : > { %v282_v14 = vsel %vm281_vm12, %v278_v13, %v280_v12  ;;  %286 = vst.msk [vmem:[%s552_s14] sm:$0xc0] %vm285_vm13, %v278_v13 }
  0x9f   : > { %287 = vst [vmem:[%s552_s14 + $0x8] sm:$0xc0] %v282_v14  ;;  %289 = vst.msk [vmem:[%s552_s14] sm:$0xc0] %vm288_vm14, %v518_v49 }
  0xa0   : > { %v383_v15 = vpop.permute.xlu1 %382 }
  0xa1   : > { %390 = vst.msk [vmem:[%s552_s14 + $0x28] sm:$0xc] %vm389_vm15, %v383_v15  ;;  %v381_v16 = vpop.permute.xlu0 %380 }
  0xa2   : > { %392 = vst.msk [vmem:[%s552_s14 + $0x28] sm:$0xc] %vm391_vm0, %v518_v49  ;;  %v385_v17 = vsel %vm384_vm1, %v381_v16, %v383_v15 }
  0xa3   : > { %388 = vst [vmem:[%s552_s14 + $0x20] sm:$0xc] %v385_v17 }
  0xa4 PF: > { %s11_s6 = sadd.s32 1, %s508_s6  }
  0xa5   : > { %p8_p4 = scmp.ge.s32.totalorder %s11_s6, 4  }
  0xa7   :  { %10 = sbr.rel (!%p8_p4) target bundleno = 1 (0x1), region = 54 }

</bundles_post_ra>
